<compile_context>
chip_gen: v7x
topology: tpu7x:2x2x1
jax: 0.10.0
libtpu: 0.0.40
codegen_flags: <defaults>
</compile_context>

<pallas_src>
import math

import jax
import jax.numpy as jnp
from jax.experimental import pallas as pl
from jax.experimental.pallas import tpu as pltpu

_SQRT_HALF = 1.0 / math.sqrt(2.0)


def _erf_f32(x):
    # Eigen / XLA single-precision rational erf approximation.  The final
    # divide goes through the EUP via pl.reciprocal(approx=True).
    x = jnp.clip(x, -4.0, 4.0)
    x2 = x * x
    p = x2 * (-2.72614225801306e-10) + 2.77068142495902e-08
    p = x2 * p + (-2.10102402082508e-06)
    p = x2 * p + (-5.69250639462346e-05)
    p = x2 * p + (-7.34990630326855e-04)
    p = x2 * p + (-2.95459980854025e-03)
    p = x2 * p + (-1.60960333262415e-02)
    p = x * p
    q = x2 * (-1.45660718464996e-05) + (-2.13374055278905e-04)
    q = x2 * q + (-1.68282697438203e-03)
    q = x2 * q + (-7.37332916720468e-03)
    q = x2 * q + (-1.42647390514189e-02)
    return p * pl.reciprocal(q, approx=True)


def _gelu_exact(x):
    # torch.nn.GELU() default (erf form): 0.5 * x * (1 + erf(x / sqrt(2)))
    return 0.5 * x * (1.0 + _erf_f32(x * _SQRT_HALF))


def _make_kernel(n_layers, use_bf16):
    """Fused kernel over all up-sampling layers.

    Ref order: [trend_coarsest, ..., trend_finest,
                w1_0, b1_0, w2_0, b2_0, ..., out_coarsest, ..., out_finest]
    Trend blocks are [TC, L_i]; output blocks are [L_i, TC] (lane-dense C).
    """
    n_levels = n_layers + 1
    mm_dtype = jnp.bfloat16 if use_bf16 else jnp.float32

    def kernel(*refs):
        trend_refs = refs[:n_levels]
        w_refs = refs[n_levels:n_levels + 4 * n_layers]
        out_refs = refs[n_levels + 4 * n_layers:]

        out_low = trend_refs[0][...]              # [TC, L_coarsest], f32
        out_refs[0][...] = out_low.T              # [L_coarsest, TC]
        for i in range(n_layers):                 # static unrolled layer loop
            w1_ref, b1_ref, w2_ref, b2_ref = w_refs[4 * i:4 * i + 4]
            y = jnp.dot(out_low.astype(mm_dtype), w1_ref[...],
                        preferred_element_type=jnp.float32) + b1_ref[...]
            y = _gelu_exact(y)
            y = jnp.dot(y.astype(mm_dtype), w2_ref[...],
                        preferred_element_type=jnp.float32) + b2_ref[...]
            out_low = trend_refs[i + 1][...] + y  # residual in f32
            out_refs[i + 1][...] = out_low.T      # [L_i, TC], lane-dense C

    return kernel


def _choose_channel_tile(C, max_tc=512):
    """Channel tile: full C when small; otherwise a 128-multiple divisor so the
    lane-dense output block satisfies the (8, 128) constraint."""
    if C <= max_tc:
        return C
    for tc in range(max_tc - max_tc % 128, 0, -128):
        if C % tc == 0:
            return tc
    return C


def multi_scale_trend_mixing(trend_list, params, use_bf16=True):
    """trend_list: list of [B, C, L_i] with L_i = n_steps // dw**i (finest
    first).  Returns list of [B, L_i, C] (finest first), like PyTorch."""
    rev = list(trend_list)[::-1]                      # coarsest first
    n_layers = len(rev) - 1
    B, C, _ = rev[0].shape
    lengths = [int(t.shape[-1]) for t in rev]         # coarsest-first lengths
    TC = _choose_channel_tile(C)

    w_dtype = jnp.bfloat16 if use_bf16 else jnp.float32
    weight_args = []
    weight_specs = []
    for (w1, b1, w2, b2) in params:                   # weights stay resident
        weight_args += [w1.astype(w_dtype), b1.astype(jnp.float32),
                        w2.astype(w_dtype), b2.astype(jnp.float32)]
        for w in (w1, b1, w2, b2):
            weight_specs.append(pl.BlockSpec(w.shape, lambda b, c: (0, 0)))

    in_specs = [pl.BlockSpec((None, TC, L), lambda b, c: (b, c, 0))
                for L in lengths] + weight_specs
    out_specs = [pl.BlockSpec((None, L, TC), lambda b, c: (b, 0, c))
                 for L in lengths]
    out_shape = [jax.ShapeDtypeStruct((B, L, C), jnp.float32) for L in lengths]

    kernel = _make_kernel(n_layers, use_bf16)
    outs = pl.pallas_call(
        kernel,
        out_shape=out_shape,
        grid=(B, C // TC),
        in_specs=in_specs,
        out_specs=out_specs,
        compiler_params=pltpu.CompilerParams(
            dimension_semantics=("parallel", "parallel"),
            vmem_limit_bytes=32 * 1024 * 1024,
        ),
    )(*rev, *weight_args)

    outs = list(outs)
    outs.reverse()                                    # finest first
    return outs


def make_params(n_steps, downsampling_window, downsampling_layers, key):
    """Deterministic init matching nn.Linear defaults (U(-1/sqrt(fan_in), .)).
    Layer order matches `for i in reversed(range(downsampling_layers))`."""
    params = []
    for i in reversed(range(downsampling_layers)):
        l_in = n_steps // downsampling_window ** (i + 1)
        l_out = n_steps // downsampling_window ** i
        key, k1, k2, k3, k4 = jax.random.split(key, 5)
        bnd1 = 1.0 / math.sqrt(l_in)
        w1 = jax.random.uniform(k1, (l_in, l_out), jnp.float32, -bnd1, bnd1)
        b1 = jax.random.uniform(k2, (1, l_out), jnp.float32, -bnd1, bnd1)
        bnd2 = 1.0 / math.sqrt(l_out)
        w2 = jax.random.uniform(k3, (l_out, l_out), jnp.float32, -bnd2, bnd2)
        b2 = jax.random.uniform(k4, (1, l_out), jnp.float32, -bnd2, bnd2)
        params.append((w1, b1, w2, b2))
    return params


def _reference(trend_list, params):
    """Pure-JAX f32 reference of the PyTorch forward (sanity check)."""
    rev = list(trend_list)[::-1]
    out_low = rev[0]
    out_high = rev[1]
    out_trend = [jnp.transpose(out_low, (0, 2, 1))]
    for i in range(len(rev) - 1):
        w1, b1, w2, b2 = params[i]
        y = jnp.einsum("bcl,lm->bcm", out_low, w1) + b1[0]
        y = jax.nn.gelu(y, approximate=False)
        y = jnp.einsum("bcm,mn->bcn", y, w2) + b2[0]
        out_low = out_high + y
        if i + 2 <= len(rev) - 1:
            out_high = rev[i + 2]
        out_trend.append(jnp.transpose(out_low, (0, 2, 1)))
    out_trend.reverse()
    return out_trend


if __name__ == "__main__":
    n_steps, downsampling_window, downsampling_layers = 16, 2, 2
    B, C = 2, 4

    key = jax.random.PRNGKey(0)
    pkey, xkey = jax.random.split(key)
    params = make_params(n_steps, downsampling_window, downsampling_layers, pkey)

    trend_list = []
    for i in range(downsampling_layers + 1):
        xkey, k = jax.random.split(xkey)
        L = n_steps // downsampling_window ** i
        trend_list.append(jax.random.normal(k, (B, C, L), jnp.float32))

    outs = multi_scale_trend_mixing(trend_list, params)
    outs = jax.block_until_ready(outs)

    refs = _reference(trend_list, params)
    for o, r in zip(outs, refs):
        assert o.shape == r.shape, (o.shape, r.shape)
        err = float(jnp.max(jnp.abs(o - r)))
        # Tolerance covers intentional bf16 matmul operands + approx reciprocal.
        assert jnp.allclose(o, r, rtol=2e-2, atol=2e-2), err

    print("KERNEL_OK")
</pallas_src>

<mosaic_0001>
module attributes {stable_mosaic.version = 11 : i64} {
  func.func @kernel(%arg0: i32, %arg1: i32, %arg2: memref<1x4x4xf32, #tpu.memory_space<vmem>>, %arg3: memref<1x4x8xf32, #tpu.memory_space<vmem>>, %arg4: memref<1x4x16xf32, #tpu.memory_space<vmem>>, %arg5: memref<4x8xbf16, #tpu.memory_space<vmem>>, %arg6: memref<1x8xf32, #tpu.memory_space<vmem>>, %arg7: memref<8x8xbf16, #tpu.memory_space<vmem>>, %arg8: memref<1x8xf32, #tpu.memory_space<vmem>>, %arg9: memref<8x16xbf16, #tpu.memory_space<vmem>>, %arg10: memref<1x16xf32, #tpu.memory_space<vmem>>, %arg11: memref<16x16xbf16, #tpu.memory_space<vmem>>, %arg12: memref<1x16xf32, #tpu.memory_space<vmem>>, %arg13: memref<1x4x4xf32, #tpu.memory_space<vmem>>, %arg14: memref<1x8x4xf32, #tpu.memory_space<vmem>>, %arg15: memref<1x16x4xf32, #tpu.memory_space<vmem>>) attributes {dimension_semantics = [#tpu.dimension_semantics<parallel>, #tpu.dimension_semantics<parallel>], iteration_bounds = array<i64: 2, 1>, scalar_prefetch = 0 : i64, scratch_operands = 0 : i64, tpu.core_type = #tpu.core_type<tc>, window_params = [{transform_indices = @transform_0, window_bounds = array<i64: 1, 4, 4>}, {transform_indices = @transform_1, window_bounds = array<i64: 1, 4, 8>}, {transform_indices = @transform_2, window_bounds = array<i64: 1, 4, 16>}, {pipeline_mode = #tpu.pipeline_mode<synchronous>, transform_indices = @transform_3, window_bounds = array<i64: 4, 8>}, {pipeline_mode = #tpu.pipeline_mode<synchronous>, transform_indices = @transform_4, window_bounds = array<i64: 1, 8>}, {pipeline_mode = #tpu.pipeline_mode<synchronous>, transform_indices = @transform_5, window_bounds = array<i64: 8, 8>}, {pipeline_mode = #tpu.pipeline_mode<synchronous>, transform_indices = @transform_6, window_bounds = array<i64: 1, 8>}, {pipeline_mode = #tpu.pipeline_mode<synchronous>, transform_indices = @transform_7, window_bounds = array<i64: 8, 16>}, {pipeline_mode = #tpu.pipeline_mode<synchronous>, transform_indices = @transform_8, window_bounds = array<i64: 1, 16>}, {pipeline_mode = #tpu.pipeline_mode<synchronous>, transform_indices = @transform_9, window_bounds = array<i64: 16, 16>}, {pipeline_mode = #tpu.pipeline_mode<synchronous>, transform_indices = @transform_10, window_bounds = array<i64: 1, 16>}, {transform_indices = @transform_11, window_bounds = array<i64: 1, 4, 4>}, {transform_indices = @transform_12, window_bounds = array<i64: 1, 8, 4>}, {transform_indices = @transform_13, window_bounds = array<i64: 1, 16, 4>}]} {
    %c0 = arith.constant 0 : index
    %c0_0 = arith.constant 0 : index
    %c0_1 = arith.constant 0 : index
    %0 = vector.load %arg2[%c0, %c0_0, %c0_1] : memref<1x4x4xf32, #tpu.memory_space<vmem>>, vector<1x4x4xf32>
    %1 = vector.shape_cast %0 : vector<1x4x4xf32> to vector<4x4xf32>
    %2 = tpu.transpose %1, [1, 0] : vector<4x4xf32> -> vector<4x4xf32>
    %c0_2 = arith.constant 0 : index
    %c0_3 = arith.constant 0 : index
    %c0_4 = arith.constant 0 : index
    %3 = vector.load %arg13[%c0_2, %c0_3, %c0_4] : memref<1x4x4xf32, #tpu.memory_space<vmem>>, vector<1x4x4xf32>
    %4 = vector.shape_cast %3 : vector<1x4x4xf32> to vector<4x4xf32>
    %5 = vector.shape_cast %2 : vector<4x4xf32> to vector<1x4x4xf32>
    tpu.vector_store %arg13[%c0_2, %c0_3, %c0_4], %5 {strides = array<i32>} : memref<1x4x4xf32, #tpu.memory_space<vmem>>, vector<1x4x4xf32>,
    %6 = arith.truncf %1 : vector<4x4xf32> to vector<4x4xbf16>
    %c0_5 = arith.constant 0 : index
    %c0_6 = arith.constant 0 : index
    %7 = vector.load %arg5[%c0_5, %c0_6] : memref<4x8xbf16, #tpu.memory_space<vmem>>, vector<4x8xbf16>
    %cst = arith.constant dense<0.000000e+00> : vector<4x8xf32>
    %8 = tpu.matmul %6, %7, %cst {dimension_numbers = #tpu.dot_dimension_numbers<[1], [0], [0], [1], [0, 0, 1, 1], [], []>} : vector<4x4xbf16>, vector<4x8xbf16>, vector<4x8xf32> -> vector<4x8xf32>
    %c0_7 = arith.constant 0 : index
    %c0_8 = arith.constant 0 : index
    %9 = vector.load %arg6[%c0_7, %c0_8] : memref<1x8xf32, #tpu.memory_space<vmem>>, vector<1x8xf32>
    %10 = vector.broadcast %9 : vector<1x8xf32> to vector<4x8xf32>
    %11 = arith.addf %8, %10 : vector<4x8xf32>
    %cst_9 = arith.constant 5.000000e-01 : f32
    %12 = vector.broadcast %cst_9 : f32 to vector<4x8xf32>
    %13 = arith.mulf %12, %11 : vector<4x8xf32>
    %cst_10 = arith.constant 0.707106769 : f32
    %14 = vector.broadcast %cst_10 : f32 to vector<4x8xf32>
    %15 = arith.mulf %11, %14 : vector<4x8xf32>
    %cst_11 = arith.constant -4.000000e+00 : f32
    %cst_12 = arith.constant 4.000000e+00 : f32
    %16 = vector.broadcast %cst_11 : f32 to vector<4x8xf32>
    %17 = arith.maximumf %16, %15 : vector<4x8xf32>
    %18 = vector.broadcast %cst_12 : f32 to vector<4x8xf32>
    %19 = arith.minimumf %18, %17 : vector<4x8xf32>
    %20 = arith.mulf %19, %19 : vector<4x8xf32>
    %cst_13 = arith.constant -2.72614237E-10 : f32
    %21 = vector.broadcast %cst_13 : f32 to vector<4x8xf32>
    %22 = arith.mulf %20, %21 : vector<4x8xf32>
    %cst_14 = arith.constant 2.77068146E-8 : f32
    %23 = vector.broadcast %cst_14 : f32 to vector<4x8xf32>
    %24 = arith.addf %22, %23 : vector<4x8xf32>
    %25 = arith.mulf %20, %24 : vector<4x8xf32>
    %cst_15 = arith.constant -2.10102394E-6 : f32
    %26 = vector.broadcast %cst_15 : f32 to vector<4x8xf32>
    %27 = arith.addf %25, %26 : vector<4x8xf32>
    %28 = arith.mulf %20, %27 : vector<4x8xf32>
    %cst_16 = arith.constant -5.69250624E-5 : f32
    %29 = vector.broadcast %cst_16 : f32 to vector<4x8xf32>
    %30 = arith.addf %28, %29 : vector<4x8xf32>
    %31 = arith.mulf %20, %30 : vector<4x8xf32>
    %cst_17 = arith.constant -7.34990637E-4 : f32
    %32 = vector.broadcast %cst_17 : f32 to vector<4x8xf32>
    %33 = arith.addf %31, %32 : vector<4x8xf32>
    %34 = arith.mulf %20, %33 : vector<4x8xf32>
    %cst_18 = arith.constant -2.954600e-03 : f32
    %35 = vector.broadcast %cst_18 : f32 to vector<4x8xf32>
    %36 = arith.addf %34, %35 : vector<4x8xf32>
    %37 = arith.mulf %20, %36 : vector<4x8xf32>
    %cst_19 = arith.constant -0.0160960332 : f32
    %38 = vector.broadcast %cst_19 : f32 to vector<4x8xf32>
    %39 = arith.addf %37, %38 : vector<4x8xf32>
    %40 = arith.mulf %19, %39 : vector<4x8xf32>
    %cst_20 = arith.constant -1.45660715E-5 : f32
    %41 = vector.broadcast %cst_20 : f32 to vector<4x8xf32>
    %42 = arith.mulf %20, %41 : vector<4x8xf32>
    %cst_21 = arith.constant -2.13374049E-4 : f32
    %43 = vector.broadcast %cst_21 : f32 to vector<4x8xf32>
    %44 = arith.addf %42, %43 : vector<4x8xf32>
    %45 = arith.mulf %20, %44 : vector<4x8xf32>
    %cst_22 = arith.constant -0.00168282702 : f32
    %46 = vector.broadcast %cst_22 : f32 to vector<4x8xf32>
    %47 = arith.addf %45, %46 : vector<4x8xf32>
    %48 = arith.mulf %20, %47 : vector<4x8xf32>
    %cst_23 = arith.constant -0.00737332925 : f32
    %49 = vector.broadcast %cst_23 : f32 to vector<4x8xf32>
    %50 = arith.addf %48, %49 : vector<4x8xf32>
    %51 = arith.mulf %20, %50 : vector<4x8xf32>
    %cst_24 = arith.constant -0.0142647391 : f32
    %52 = vector.broadcast %cst_24 : f32 to vector<4x8xf32>
    %53 = arith.addf %51, %52 : vector<4x8xf32>
    %54 = tpu.reciprocal %53 {approx = true} : vector<4x8xf32> -> vector<4x8xf32>
    %55 = arith.mulf %40, %54 : vector<4x8xf32>
    %cst_25 = arith.constant 1.000000e+00 : f32
    %56 = vector.broadcast %cst_25 : f32 to vector<4x8xf32>
    %57 = arith.addf %56, %55 : vector<4x8xf32>
    %58 = arith.mulf %13, %57 : vector<4x8xf32>
    %59 = arith.truncf %58 : vector<4x8xf32> to vector<4x8xbf16>
    %c0_26 = arith.constant 0 : index
    %c0_27 = arith.constant 0 : index
    %60 = vector.load %arg7[%c0_26, %c0_27] : memref<8x8xbf16, #tpu.memory_space<vmem>>, vector<8x8xbf16>
    %cst_28 = arith.constant dense<0.000000e+00> : vector<4x8xf32>
    %61 = tpu.matmul %59, %60, %cst_28 {dimension_numbers = #tpu.dot_dimension_numbers<[1], [0], [0], [1], [0, 0, 1, 1], [], []>} : vector<4x8xbf16>, vector<8x8xbf16>, vector<4x8xf32> -> vector<4x8xf32>
    %c0_29 = arith.constant 0 : index
    %c0_30 = arith.constant 0 : index
    %62 = vector.load %arg8[%c0_29, %c0_30] : memref<1x8xf32, #tpu.memory_space<vmem>>, vector<1x8xf32>
    %63 = vector.broadcast %62 : vector<1x8xf32> to vector<4x8xf32>
    %64 = arith.addf %61, %63 : vector<4x8xf32>
    %c0_31 = arith.constant 0 : index
    %c0_32 = arith.constant 0 : index
    %c0_33 = arith.constant 0 : index
    %65 = vector.load %arg3[%c0_31, %c0_32, %c0_33] : memref<1x4x8xf32, #tpu.memory_space<vmem>>, vector<1x4x8xf32>
    %66 = vector.shape_cast %65 : vector<1x4x8xf32> to vector<4x8xf32>
    %67 = arith.addf %66, %64 : vector<4x8xf32>
    %68 = tpu.transpose %67, [1, 0] : vector<4x8xf32> -> vector<8x4xf32>
    %c0_34 = arith.constant 0 : index
    %c0_35 = arith.constant 0 : index
    %c0_36 = arith.constant 0 : index
    %69 = vector.load %arg14[%c0_34, %c0_35, %c0_36] : memref<1x8x4xf32, #tpu.memory_space<vmem>>, vector<1x8x4xf32>
    %70 = vector.shape_cast %69 : vector<1x8x4xf32> to vector<8x4xf32>
    %71 = vector.shape_cast %68 : vector<8x4xf32> to vector<1x8x4xf32>
    tpu.vector_store %arg14[%c0_34, %c0_35, %c0_36], %71 {strides = array<i32>} : memref<1x8x4xf32, #tpu.memory_space<vmem>>, vector<1x8x4xf32>,
    %72 = arith.truncf %67 : vector<4x8xf32> to vector<4x8xbf16>
    %c0_37 = arith.constant 0 : index
    %c0_38 = arith.constant 0 : index
    %73 = vector.load %arg9[%c0_37, %c0_38] : memref<8x16xbf16, #tpu.memory_space<vmem>>, vector<8x16xbf16>
    %cst_39 = arith.constant dense<0.000000e+00> : vector<4x16xf32>
    %74 = tpu.matmul %72, %73, %cst_39 {dimension_numbers = #tpu.dot_dimension_numbers<[1], [0], [0], [1], [0, 0, 1, 1], [], []>} : vector<4x8xbf16>, vector<8x16xbf16>, vector<4x16xf32> -> vector<4x16xf32>
    %c0_40 = arith.constant 0 : index
    %c0_41 = arith.constant 0 : index
    %75 = vector.load %arg10[%c0_40, %c0_41] : memref<1x16xf32, #tpu.memory_space<vmem>>, vector<1x16xf32>
    %76 = vector.broadcast %75 : vector<1x16xf32> to vector<4x16xf32>
    %77 = arith.addf %74, %76 : vector<4x16xf32>
    %cst_42 = arith.constant 5.000000e-01 : f32
    %78 = vector.broadcast %cst_42 : f32 to vector<4x16xf32>
    %79 = arith.mulf %78, %77 : vector<4x16xf32>
    %cst_43 = arith.constant 0.707106769 : f32
    %80 = vector.broadcast %cst_43 : f32 to vector<4x16xf32>
    %81 = arith.mulf %77, %80 : vector<4x16xf32>
    %cst_44 = arith.constant -4.000000e+00 : f32
    %cst_45 = arith.constant 4.000000e+00 : f32
    %82 = vector.broadcast %cst_44 : f32 to vector<4x16xf32>
    %83 = arith.maximumf %82, %81 : vector<4x16xf32>
    %84 = vector.broadcast %cst_45 : f32 to vector<4x16xf32>
    %85 = arith.minimumf %84, %83 : vector<4x16xf32>
    %86 = arith.mulf %85, %85 : vector<4x16xf32>
    %cst_46 = arith.constant -2.72614237E-10 : f32
    %87 = vector.broadcast %cst_46 : f32 to vector<4x16xf32>
    %88 = arith.mulf %86, %87 : vector<4x16xf32>
    %cst_47 = arith.constant 2.77068146E-8 : f32
    %89 = vector.broadcast %cst_47 : f32 to vector<4x16xf32>
    %90 = arith.addf %88, %89 : vector<4x16xf32>
    %91 = arith.mulf %86, %90 : vector<4x16xf32>
    %cst_48 = arith.constant -2.10102394E-6 : f32
    %92 = vector.broadcast %cst_48 : f32 to vector<4x16xf32>
    %93 = arith.addf %91, %92 : vector<4x16xf32>
    %94 = arith.mulf %86, %93 : vector<4x16xf32>
    %cst_49 = arith.constant -5.69250624E-5 : f32
    %95 = vector.broadcast %cst_49 : f32 to vector<4x16xf32>
    %96 = arith.addf %94, %95 : vector<4x16xf32>
    %97 = arith.mulf %86, %96 : vector<4x16xf32>
    %cst_50 = arith.constant -7.34990637E-4 : f32
    %98 = vector.broadcast %cst_50 : f32 to vector<4x16xf32>
    %99 = arith.addf %97, %98 : vector<4x16xf32>
    %100 = arith.mulf %86, %99 : vector<4x16xf32>
    %cst_51 = arith.constant -2.954600e-03 : f32
    %101 = vector.broadcast %cst_51 : f32 to vector<4x16xf32>
    %102 = arith.addf %100, %101 : vector<4x16xf32>
    %103 = arith.mulf %86, %102 : vector<4x16xf32>
    %cst_52 = arith.constant -0.0160960332 : f32
    %104 = vector.broadcast %cst_52 : f32 to vector<4x16xf32>
    %105 = arith.addf %103, %104 : vector<4x16xf32>
    %106 = arith.mulf %85, %105 : vector<4x16xf32>
    %cst_53 = arith.constant -1.45660715E-5 : f32
    %107 = vector.broadcast %cst_53 : f32 to vector<4x16xf32>
    %108 = arith.mulf %86, %107 : vector<4x16xf32>
    %cst_54 = arith.constant -2.13374049E-4 : f32
    %109 = vector.broadcast %cst_54 : f32 to vector<4x16xf32>
    %110 = arith.addf %108, %109 : vector<4x16xf32>
    %111 = arith.mulf %86, %110 : vector<4x16xf32>
    %cst_55 = arith.constant -0.00168282702 : f32
    %112 = vector.broadcast %cst_55 : f32 to vector<4x16xf32>
    %113 = arith.addf %111, %112 : vector<4x16xf32>
    %114 = arith.mulf %86, %113 : vector<4x16xf32>
    %cst_56 = arith.constant -0.00737332925 : f32
    %115 = vector.broadcast %cst_56 : f32 to vector<4x16xf32>
    %116 = arith.addf %114, %115 : vector<4x16xf32>
    %117 = arith.mulf %86, %116 : vector<4x16xf32>
    %cst_57 = arith.constant -0.0142647391 : f32
    %118 = vector.broadcast %cst_57 : f32 to vector<4x16xf32>
    %119 = arith.addf %117, %118 : vector<4x16xf32>
    %120 = tpu.reciprocal %119 {approx = true} : vector<4x16xf32> -> vector<4x16xf32>
    %121 = arith.mulf %106, %120 : vector<4x16xf32>
    %cst_58 = arith.constant 1.000000e+00 : f32
    %122 = vector.broadcast %cst_58 : f32 to vector<4x16xf32>
    %123 = arith.addf %122, %121 : vector<4x16xf32>
    %124 = arith.mulf %79, %123 : vector<4x16xf32>
    %125 = arith.truncf %124 : vector<4x16xf32> to vector<4x16xbf16>
    %c0_59 = arith.constant 0 : index
    %c0_60 = arith.constant 0 : index
    %126 = vector.load %arg11[%c0_59, %c0_60] : memref<16x16xbf16, #tpu.memory_space<vmem>>, vector<16x16xbf16>
    %cst_61 = arith.constant dense<0.000000e+00> : vector<4x16xf32>
    %127 = tpu.matmul %125, %126, %cst_61 {dimension_numbers = #tpu.dot_dimension_numbers<[1], [0], [0], [1], [0, 0, 1, 1], [], []>} : vector<4x16xbf16>, vector<16x16xbf16>, vector<4x16xf32> -> vector<4x16xf32>
    %c0_62 = arith.constant 0 : index
    %c0_63 = arith.constant 0 : index
    %128 = vector.load %arg12[%c0_62, %c0_63] : memref<1x16xf32, #tpu.memory_space<vmem>>, vector<1x16xf32>
    %129 = vector.broadcast %128 : vector<1x16xf32> to vector<4x16xf32>
    %130 = arith.addf %127, %129 : vector<4x16xf32>
    %c0_64 = arith.constant 0 : index
    %c0_65 = arith.constant 0 : index
    %c0_66 = arith.constant 0 : index
    %131 = vector.load %arg4[%c0_64, %c0_65, %c0_66] : memref<1x4x16xf32, #tpu.memory_space<vmem>>, vector<1x4x16xf32>
    %132 = vector.shape_cast %131 : vector<1x4x16xf32> to vector<4x16xf32>
    %133 = arith.addf %132, %130 : vector<4x16xf32>
    %134 = tpu.transpose %133, [1, 0] : vector<4x16xf32> -> vector<16x4xf32>
    %c0_67 = arith.constant 0 : index
    %c0_68 = arith.constant 0 : index
    %c0_69 = arith.constant 0 : index
    %135 = vector.load %arg15[%c0_67, %c0_68, %c0_69] : memref<1x16x4xf32, #tpu.memory_space<vmem>>, vector<1x16x4xf32>
    %136 = vector.shape_cast %135 : vector<1x16x4xf32> to vector<16x4xf32>
    %137 = vector.shape_cast %134 : vector<16x4xf32> to vector<1x16x4xf32>
    tpu.vector_store %arg15[%c0_67, %c0_68, %c0_69], %137 {strides = array<i32>} : memref<1x16x4xf32, #tpu.memory_space<vmem>>, vector<1x16x4xf32>,
    return
  }
  func.func @transform_0(%arg0: i32, %arg1: i32) -> (i32, i32, i32) {
    %c0_i32 = arith.constant 0 : i32
    %c0_i32_0 = arith.constant 0 : i32
    return %arg0, %arg1, %c0_i32 : i32, i32, i32
  }
  func.func @transform_1(%arg0: i32, %arg1: i32) -> (i32, i32, i32) {
    %c0_i32 = arith.constant 0 : i32
    %c0_i32_0 = arith.constant 0 : i32
    return %arg0, %arg1, %c0_i32 : i32, i32, i32
  }
  func.func @transform_2(%arg0: i32, %arg1: i32) -> (i32, i32, i32) {
    %c0_i32 = arith.constant 0 : i32
    %c0_i32_0 = arith.constant 0 : i32
    return %arg0, %arg1, %c0_i32 : i32, i32, i32
  }
  func.func @transform_3(%arg0: i32, %arg1: i32) -> (i32, i32) {
    %c0_i32 = arith.constant 0 : i32
    %c0_i32_0 = arith.constant 0 : i32
    %c0_i32_1 = arith.constant 0 : i32
    return %c0_i32, %c0_i32_0 : i32, i32
  }
  func.func @transform_4(%arg0: i32, %arg1: i32) -> (i32, i32) {
    %c0_i32 = arith.constant 0 : i32
    %c0_i32_0 = arith.constant 0 : i32
    %c0_i32_1 = arith.constant 0 : i32
    return %c0_i32, %c0_i32_0 : i32, i32
  }
  func.func @transform_5(%arg0: i32, %arg1: i32) -> (i32, i32) {
    %c0_i32 = arith.constant 0 : i32
    %c0_i32_0 = arith.constant 0 : i32
    %c0_i32_1 = arith.constant 0 : i32
    return %c0_i32, %c0_i32_0 : i32, i32
  }
  func.func @transform_6(%arg0: i32, %arg1: i32) -> (i32, i32) {
    %c0_i32 = arith.constant 0 : i32
    %c0_i32_0 = arith.constant 0 : i32
    %c0_i32_1 = arith.constant 0 : i32
    return %c0_i32, %c0_i32_0 : i32, i32
  }
  func.func @transform_7(%arg0: i32, %arg1: i32) -> (i32, i32) {
    %c0_i32 = arith.constant 0 : i32
    %c0_i32_0 = arith.constant 0 : i32
    %c0_i32_1 = arith.constant 0 : i32
    return %c0_i32, %c0_i32_0 : i32, i32
  }
  func.func @transform_8(%arg0: i32, %arg1: i32) -> (i32, i32) {
    %c0_i32 = arith.constant 0 : i32
    %c0_i32_0 = arith.constant 0 : i32
    %c0_i32_1 = arith.constant 0 : i32
    return %c0_i32, %c0_i32_0 : i32, i32
  }
  func.func @transform_9(%arg0: i32, %arg1: i32) -> (i32, i32) {
    %c0_i32 = arith.constant 0 : i32
    %c0_i32_0 = arith.constant 0 : i32
    %c0_i32_1 = arith.constant 0 : i32
    return %c0_i32, %c0_i32_0 : i32, i32
  }
  func.func @transform_10(%arg0: i32, %arg1: i32) -> (i32, i32) {
    %c0_i32 = arith.constant 0 : i32
    %c0_i32_0 = arith.constant 0 : i32
    %c0_i32_1 = arith.constant 0 : i32
    return %c0_i32, %c0_i32_0 : i32, i32
  }
  func.func @transform_11(%arg0: i32, %arg1: i32) -> (i32, i32, i32) {
    %c0_i32 = arith.constant 0 : i32
    %c0_i32_0 = arith.constant 0 : i32
    return %arg0, %c0_i32, %arg1 : i32, i32, i32
  }
  func.func @transform_12(%arg0: i32, %arg1: i32) -> (i32, i32, i32) {
    %c0_i32 = arith.constant 0 : i32
    %c0_i32_0 = arith.constant 0 : i32
    return %arg0, %c0_i32, %arg1 : i32, i32, i32
  }
  func.func @transform_13(%arg0: i32, %arg1: i32) -> (i32, i32, i32) {
    %c0_i32 = arith.constant 0 : i32
    %c0_i32_0 = arith.constant 0 : i32
    return %arg0, %c0_i32, %arg1 : i32, i32, i32
  }
}

</mosaic_0001>

<bundles_post_ra>
// kernel: tpu_custom_call.1
= control target key start
LH: loop header
LB: loop body
LE: loop exit
PB: predicated region body
PF: predicated region fallthrough
CT: control target
= control target key end

     0   :  { %s2027_s0 = inlined_call_operand.hbm [shape: f32[2,4,4], index: 0, kind: input, shape index: {}]   ;;  %s2028_s1 = inlined_call_operand.hbm [shape: f32[2,4,8], index: 1, kind: input, shape index: {}]   ;;  %s2029_s2 = inlined_call_operand.hbm [shape: f32[2,4,16], index: 2, kind: input, shape index: {}]   ;;  %s2030_s3 = inlined_call_operand.vmem [shape: bf16[4,8], index: 3, kind: input, shape index: {}]   ;;  %s2031_s4 = inlined_call_operand.hbm [shape: f32[1,8], index: 4, kind: input, shape index: {}]   ;;  %s2032_s5 = inlined_call_operand.vmem [shape: bf16[8,8], index: 5, kind: input, shape index: {}]   ;;  %s2033_s6 = inlined_call_operand.vmem [shape: f32[1,8], index: 6, kind: input, shape index: {}]   ;;  %s2034_s7 = inlined_call_operand.vmem [shape: bf16[8,16], index: 7, kind: input, shape index: {}]   ;;  %s2035_s8 = inlined_call_operand.vmem [shape: f32[1,16], index: 8, kind: input, shape index: {}]   ;;  %s2036_s9 = inlined_call_operand.vmem [shape: bf16[16,16], index: 9, kind: input, shape index: {}]   ;;  %s2037_s10 = inlined_call_operand.vmem [shape: f32[1,16], index: 10, kind: input, shape index: {}]   ;;  %s2038_s11 = inlined_call_operand.hbm [shape: f32[2,4,4], index: 11, kind: output, shape index: {0}]   ;;  %s2039_s12 = inlined_call_operand.vmem [shape: f32[2,8,4], index: 12, kind: output, shape index: {1}]   ;;  %s2040_s13 = inlined_call_operand.vmem [shape: f32[2,16,4], index: 13, kind: output, shape index: {2}]  }
   0x1   :  { %2061 = sst [smem:[#allocation24_spill]] %s2028_s1 }
   0x2   :  { %2062 = sst [smem:[#allocation25_spill]] %s2035_s8 }
   0x3   :  { %2063 = sst [smem:[#allocation26_spill]] %s2037_s10 }
   0x4   :  { %2064 = sst [smem:[#allocation27_spill]] %s2038_s11 }
   0x5   :  { %2065 = sst [smem:[#allocation28_spill]] %s2039_s12 }
   0x6   :  { %2066 = sst [smem:[#allocation29_spill]] %s2040_s13 }
   0x7   :  { %19 = vsyncpa [#allocation3], 0 }
   0x8   :  { %21 = vsyncpa [#allocation3 + $0x1], 0 }
   0x9   :  { %22 = vsyncpa [#allocation6], 0 }
   0xa   :  { %24 = vsyncpa [#allocation6 + $0x1], 0 }
   0xb   :  { %25 = vsyncpa [#allocation9], 0 }
   0xc   :  { %26 = vsyncpa [#allocation4], 0 }
   0xd   :  { %28 = vsyncpa [#allocation4 + $0x1], 0  ;;  %s1681_s25 = smov 0   ;;  %s1683_s26 = smov 0  }
   0xe   :  { %s1685_s27 = smov 0   ;;  %s1687_s28 = smov 0  }
   0xf   :  { %s1689_s29 = smov 0   ;;  %s1691_s30 = smov 0  }
  0x10 LB: > { %2067 = sst [smem:[#allocation15_spill]] %s1582_s25  ;;  %s46_s14 = sadd.s32 1, %s1598_s29  ;;  %s1602_s30 = sphi %s1691_s30, %s34_s30   ;;  %s1598_s29 = sphi %s1689_s29, %s2109_s29   ;;  %s1594_s28 = sphi %s1687_s28, %s2108_s28   ;;  %s1590_s27 = sphi %s1685_s27, %s2107_s27   ;;  %s1586_s26 = sphi %s1683_s26, %s2111_s26   ;;  %s1582_s25 = sphi %s1681_s25, %s2110_s25  }
  0x11   : > { %2068 = sst [smem:[#allocation16_spill]] %s1590_s27  ;;  %s55_s15 = sadd.s32 1, %s1590_s27 }
  0x12   : > { %2069 = sst [smem:[#allocation17_spill]] %s1594_s28  ;;  %p48_p0 = scmp.ge.s32.totalorder %s46_s14, 2 }
  0x13   : > { %2070 = sst [smem:[#allocation18_spill]] %s1598_s29  ;;  %p2045_p1 = scmp.ne.s32.totalorder %s1590_s27, %s1586_s26 }
  0x14   : > { %2071 = sst [smem:[#allocation19_spill]] %s1602_s30  ;;  %p63_p2 = scmp.eq.s32.totalorder %s1602_s30, 0 }
  0x15   : > { %s2113_s14 = smov (%p48_p0, %s46_s14), 0  ;;  %p1335_p5 = scmp.lt.s32.totalorder %s1602_s30, 2 }
  0x16   : > { %2072 = sst [smem:[#allocation20_spill]] %s2113_s14  ;;  %p64_p4 = por %p63_p2, %p2045_p1 }
  0x17   : > { %s50_s16 = ssub.s32 %s1598_s29, %s2113_s14  ;;  %s2042_s17 = sand.u32 1, %s1590_s27  }
  0x18   : > { %p53_p6 = scmp.eq.s32.totalorder %s50_s16, 0  ;;  %s1728_s18 = sshll.u32 %s2042_s17, 2 }
  0x19   : > { %s1731_s19 = sshll.u32 %s1598_s29, 6  ;;  %p1733_p7 = pnand %p1335_p5, %p64_p4 }
  0x1a   : > { %s1738_s21 = scalar_select %p53_p6, %s1590_s27, %s55_s15  }
  0x1b   : > { %s2073_s20 = scalar_select %p1733_p7, 1, 0 }
  0x1c   : > { %2074 = sst [smem:[#allocation21_spill]] %s1738_s21  ;;  %s451_s22 = sand.u32 1, %s1602_s30  }
  0x1d   : > { %s2075_s1 = sld [smem:[#allocation24_spill]]  ;;  %s455_s16 = scalar_lea.vmem [#allocation5], %s1728_s18 }
  0x1e   : > { %s463_s17 = sshll.u32 %s455_s16, 4  ;;  %s1750_s29 = scalar_lea.sflag [#allocation6], %s451_s22  ;;  %s1748_s17 = int_to_ptr.vmem [resolvable:$true] %s463_s17 }
  0x1f   : > { %p1756_p9 = pneg %p1733_p7 }
  0x23   : > { %s1745_s14 = scalar_lea.hbm %s2075_s1, %s1731_s19  ;;  %s1399_s21 = scalar_lea.hbm %s2075_s1, 128 }
  0x24   : > { %s1394_s11 = scalar_lea.hbm %s1745_s14, 64  ;;  %p1400_p12 = scmp.lt.u32.totalorder %s1745_s14, %s2075_s1 }
  0x25   : > { %p1395_p8 = scmp.ne.s32.totalorder %s1745_s14, %s1394_s11  ;;  %p1401_p13 = scmp.lt.u32.totalorder %s1399_s21, %s1394_s11 }
  0x26   : > { %p1403_p2 = scmp.lt.u32.totalorder %s1394_s11, %s1745_s14 }
  0x27   : > { %p1397_p10 = pnand %p1756_p9, %p1395_p8  ;;  %p1402_p0 = por %p1401_p13, %p1400_p12 }
  0x29   : > { %p1398_p11 = pneg %p1397_p10  ;;  %p1404_p4 = por %p1403_p2, %p1402_p0 }
  0x2b   : > { %p1405_p5 = pnand %p1404_p4, %p1398_p11 }
  0x2d   : > { %1408 = shalt.err (!%p1405_p5)
}
  0x2e   : > { %s1409_s22 = scalar_lea.vmem %s1748_s17, 64  ;;  %s1604_s23 = smov [#allocation5]  }
  0x2f   : > { %p1410_p6 = scmp.ne.s32.totalorder %s1748_s17, %s1409_s22  ;;  %s1414_s24 = sshll.u32 %s1604_s23, 4  ;;  %s1415_s24 = int_to_ptr.vmem [resolvable:$false] %s1414_s24 }
  0x30   : > { %s1416_s13 = scalar_lea.vmem %s1415_s24, 128  ;;  %p1417_p3 = scmp.lt.s32.totalorder %s1748_s17, %s1415_s24 }
  0x31   : > { %p1412_p8 = pnand %p1410_p6, %p1756_p9  ;;  %p1418_p1 = scmp.lt.s32.totalorder %s1416_s13, %s1409_s22 }
  0x33   : > { %p1413_p10 = pneg %p1412_p8  ;;  %p1419_p12 = por %p1418_p1, %p1417_p3 }
  0x35   : > { %p1420_p13 = pnand %p1419_p12, %p1413_p10 }
  0x37   : > { %1423 = shalt.err (!%p1420_p13)
}
  0x38   : > { %1326 = dma.hbm_to_vmem [thread:$0]  (!%p1733_p7), %s1745_s14, 64, %s1748_s17, %s1750_s29  }
  0x39   : > { %s1781_s11 = sadd.s32 4294967295, %s1602_s30   ;;  %s1237_s21 = sadd.s32 4294967294, %s1602_s30  }
  0x3a   : > { %p68_p1 = scmp.ne.s32.totalorder %s1586_s26, %s1582_s25  ;;  %p2053_p3 = scmp.eq.s32.totalorder %s1781_s11, 0 }
  0x3b   : > { %p318_p11 = scmp.eq.s32.totalorder %s1781_s11, 1  ;;  %p324_p0 = scmp.eq.s32.totalorder %s1237_s21, 1 }
  0x3c   : > { %p1238_p2 = scmp.ge.s32.totalorder %s1602_s30, 1  ;;  %p1791_p4 = por %p2053_p3, %p68_p1 }
  0x3d   : > { %p2078_p5 = scmp.ne.s32.totalorder %s1590_s27, %s1586_s26  ;;  %p1802_p8 = por %p324_p0, %p68_p1 }
  0x3e   : > { %s2077_s16 = scalar_select %p1791_p4, 1, 0 }
  0x3f   : > { %p1798_p6 = por %p318_p11, %p2078_p5  ;;  %p387_p10 = scmp.lt.s32.totalorder %s1602_s30, 3 }
  0x40   : > { %s2081_s17 = scalar_select %p1802_p8, 1, 0 }
  0x41   : > { %s2079_s14 = scalar_select %p1798_p6, 1, 0 }
  0x42   : > { %2082 = sst [smem:[#allocation23_spill]] %s2081_s17  ;;  %p1807_p12 = pnand %p1238_p2, %p387_p10 }
  0x43   : > { %2080 = sst [smem:[#allocation22_spill]] %s2079_s14  ;;  %s1605_s23 = smov [#allocation8]  }
  0x44   : > { %s2083_s22 = scalar_select %p1807_p12, 1, 0 }
  0x45   : > { %s403_s24 = sshll.u32 %s1605_s23, 4  ;;  %p1316_p13 = pneg %p1807_p12  ;;  %s1811_s24 = int_to_ptr.vmem [resolvable:$true] %s403_s24 }
  0x46   : > { %s1819_s1 = scalar_lea.hbm %s2027_s0, %s1731_s19  ;;  %s436_s30 = scalar_lea.vmem [#allocation2], %s1728_s18 }
  0x47   : > { %s444_s17 = sshll.u32 %s436_s30, 4  ;;  %p1824_p1 = pnand %p1316_p13, %p2053_p3  ;;  %s445_s17 = int_to_ptr.vmem [resolvable:$true] %s444_s17 }
  0x48   : > { %s2085_s23 = sand.u32 1, %s1590_s27   ;;  %s1424_s12 = scalar_lea.hbm %s1819_s1, 64 }
  0x49   : > { %s2084_s25 = scalar_select %p1824_p1, 1, 0 }
  0x4a   : > { %s433_s14 = scalar_lea.sflag [#allocation3], %s2085_s23  ;;  %p1425_p11 = scmp.ne.s32.totalorder %s1819_s1, %s1424_s12 }
  0x4b   : > { %s1429_s10 = scalar_lea.hbm %s2027_s0, 128  ;;  %p1430_p5 = scmp.lt.u32.totalorder %s1819_s1, %s2027_s0 }
  0x4c   : > { %p1427_p0 = pnand %p1425_p11, %p1756_p9  ;;  %p1431_p10 = scmp.lt.u32.totalorder %s1429_s10, %s1424_s12 }
  0x4d   : > { %p1433_p3 = scmp.lt.u32.totalorder %s1424_s12, %s1819_s1 }
  0x4e   : > { %p1428_p2 = pneg %p1427_p0  ;;  %p1432_p13 = por %p1431_p10, %p1430_p5 }
  0x50   : > { %p1434_p8 = por %p1433_p3, %p1432_p13 }
  0x52   : > { %p1435_p6 = pnand %p1434_p8, %p1428_p2 }
  0x54   : > { %1438 = shalt.err (!%p1435_p6)
}
  0x55   : > { %s1439_s30 = scalar_lea.vmem %s445_s17, 64  ;;  %s1606_s23 = smov [#allocation2]  }
  0x56   : > { %p1440_p4 = scmp.ne.s32.totalorder %s445_s17, %s1439_s30  ;;  %s1444_s27 = sshll.u32 %s1606_s23, 4  ;;  %s1445_s27 = int_to_ptr.vmem [resolvable:$false] %s1444_s27 }
  0x57   : > { %s1446_s13 = scalar_lea.vmem %s1445_s27, 128  ;;  %p1447_p12 = scmp.lt.s32.totalorder %s445_s17, %s1445_s27 }
  0x58   : > { %p1442_p11 = pnand %p1440_p4, %p1756_p9  ;;  %p1448_p1 = scmp.lt.s32.totalorder %s1446_s13, %s1439_s30 }
  0x5a   : > { %p1443_p0 = pneg %p1442_p11  ;;  %p1449_p7 = por %p1448_p1, %p1447_p12 }
  0x5c   : > { %p1450_p5 = pnand %p1449_p7, %p1443_p0 }
  0x5e   : > { %1453 = shalt.err (!%p1450_p5)
}
  0x5f   : > { %p2086_p10 = scmp.ne.s32.totalorder %s2073_s20, 0  ;;  %s1454_s12 = scalar_lea.hbm %s2031_s4, 16 }
  0x60   : > { %p1455_p3 = scmp.ne.s32.totalorder %s2031_s4, %s1454_s12  ;;  %p2087_p4 = scmp.ne.s32.totalorder %s2084_s25, 0 }
  0x61   : > { %1323 = dma.hbm_to_vmem [thread:$0]  (!%p2086_p10), %s1819_s1, 64, %s445_s17, %s433_s14  }
  0x62   : > { %p1456_p6 = pneg %p2087_p4  ;;  %p1461_p7 = scmp.lt.u32.totalorder %s1454_s12, %s2031_s4 }
  0x64   : > { %p1457_p8 = pnand %p1456_p6, %p1455_p3 }
  0x66   : > { %p1458_p2 = pneg %p1457_p8 }
  0x68   : > { %p1463_p12 = pnand %p1461_p7, %p1458_p2 }
  0x6a   : > { %1466 = shalt.err (!%p1463_p12)
}
  0x6b   : > { %s1467_s1 = scalar_lea.vmem %s1811_s24, 16  ;;  %s1474_s14 = scalar_lea.vmem %s1811_s24, 32 }
  0x6c   : > { %p1468_p1 = scmp.ne.s32.totalorder %s1811_s24, %s1467_s1  ;;  %p1475_p0 = scmp.lt.s32.totalorder %s1811_s24, %s1811_s24 }
  0x6d   : > { %p1476_p5 = scmp.lt.s32.totalorder %s1474_s14, %s1467_s1 }
  0x6e   : > { %p1470_p13 = pnand %p1468_p1, %p1456_p6 }
  0x6f   : > { %p1477_p3 = por %p1476_p5, %p1475_p0 }
  0x70   : > { %p1471_p11 = pneg %p1470_p13 }
  0x72   : > { %p1478_p8 = pnand %p1477_p3, %p1471_p11 }
  0x74   : > { %1481 = shalt.err (!%p1478_p8)
}
  0x75   : > { %1319 = dma.hbm_to_vmem [thread:$0]  (!%p2087_p4), %s2031_s4, 16, %s1811_s24, [#allocation9]  }
  0x76   : > { %s1873_s10 = scalar_lea.hbm %s2029_s2, %s1731_s19  ;;  %s474_s12 = scalar_lea.vmem [#allocation7], %s1728_s18 }
  0x77   : > { %s482_s28 = sshll.u32 %s474_s12, 4  ;;  %s1482_s25 = scalar_lea.hbm %s1873_s10, 64  ;;  %s483_s28 = int_to_ptr.vmem [resolvable:$true] %s482_s28 }
  0x78   : > { %p1483_p6 = scmp.ne.s32.totalorder %s1873_s10, %s1482_s25  ;;  %s1487_s24 = scalar_lea.hbm %s2029_s2, 128 }
  0x79   : > { %p1488_p4 = scmp.lt.u32.totalorder %s1873_s10, %s2029_s2  ;;  %p1489_p12 = scmp.lt.u32.totalorder %s1487_s24, %s1482_s25 }
  0x7a   : > { %p1485_p2 = pnand %p1483_p6, %p1756_p9  ;;  %p1491_p13 = scmp.lt.u32.totalorder %s1482_s25, %s1873_s10 }
  0x7b   : > { %p1490_p1 = por %p1489_p12, %p1488_p4 }
  0x7c   : > { %p1486_p7 = pneg %p1485_p2 }
  0x7d   : > { %p1492_p11 = por %p1491_p13, %p1490_p1 }
  0x7f   : > { %p1493_p0 = pnand %p1492_p11, %p1486_p7 }
  0x81   : > { %1496 = shalt.err (!%p1493_p0)
}
  0x82   : > { %s1497_s18 = scalar_lea.vmem %s483_s28, 64  ;;  %s1607_s19 = smov [#allocation7]  }
  0x83   : > { %p1498_p5 = scmp.ne.s32.totalorder %s483_s28, %s1497_s18  ;;  %s1502_s14 = sshll.u32 %s1607_s19, 4  ;;  %s1503_s14 = int_to_ptr.vmem [resolvable:$false] %s1502_s14 }
  0x84   : > { %s1504_s17 = scalar_lea.vmem %s1503_s14, 128  ;;  %p1505_p6 = scmp.lt.s32.totalorder %s483_s28, %s1503_s14 }
  0x85   : > { %p1500_p3 = pnand %p1498_p5, %p1756_p9  ;;  %p1506_p2 = scmp.lt.s32.totalorder %s1504_s17, %s1497_s18 }
  0x87   : > { %p1501_p8 = pneg %p1500_p3  ;;  %p1507_p10 = por %p1506_p2, %p1505_p6 }
  0x89   : > { %p1508_p4 = pnand %p1507_p10, %p1501_p8 }
  0x8b   : > { %1511 = shalt.err (!%p1508_p4)
}
  0x8c   : > { %p2088_p12 = scmp.ne.s32.totalorder %s2073_s20, 0  ;;  %p2089_p7 = scmp.ne.s32.totalorder %s2083_s22, 0 }
  0x8d   : > { %s1897_s15 = sand.u32 (!%p2089_p7), 1, %s1586_s26   ;;  %p2090_p9 = scmp.ne.s32.totalorder (!%p2089_p7), %s2077_s16, 0 }
  0x8e   : > { %1329 = dma.hbm_to_vmem [thread:$0]  (!%p2088_p12), %s1873_s10, 64, %s483_s28, %s1750_s29  }
  0x8f   : > { %491 = sbr.rel (%p2089_p7) target bundleno = 1258 (0x4ea), region = 64  ;;  %s1900_s23 = sshll.u32 (!%p2089_p7), %s1897_s15, 2 }
  0x90   : > { %s494_s13 = scalar_lea.sflag (!%p2089_p7), [#allocation3], %s1897_s15  ;;  %s497_s8 = scalar_lea.vmem (!%p2089_p7), [#allocation2], %s1900_s23 }
  0x96   : > { %1565 = dma.done.wait (%p2090_p9), %s494_s13, 64  }
  0x97   : > { %1567 = vsyncadd (%p2090_p9), %s494_s13, 4294967232  ;;  %s502_s29 = sand.u32 1, %s1781_s11   ;;  %s506_s22 = scalar_lea.vmem [#allocation5], %s1900_s23 }
  0x98   : > { %s503_s20 = scalar_lea.sflag [#allocation6], %s502_s29 }
  0x99   : > { %1569 = dma.done.wait (%p2090_p9), %s503_s20, 128  }
  0x9a   : > { %1571 = vsyncadd (%p2090_p9), %s503_s20, 4294967168  ;;  %s515_s10 = scalar_lea.vmem [#allocation7], %s1900_s23  ;;  %p2091_p10 = scmp.eq.s32.totalorder %s1781_s11, 0 }
  0x9c   : > { %1573 = dma.done.wait (%p2091_p10), [#allocation9], 16   ;;  %p2092_p1 = pmov %p2091_p10 }
  0x9d   : > { %v1608_v0 = vmov 0.0   ;;  %vm1609_vm0 = vmmov 0   ;;  %vm651_vm1 = vcmask 1041408   ;;  %v639_v1 = vld [vmem:[%s2030_s3] sm:$0x3]  ;;  %vm647_vm2 = vcmask 31744  }
  0x9e   : > { %1575 = vsyncadd (%p2092_p1), [#allocation9], 4294967280  ;;  %1280 = vmatprep.subr.bf16.mxu0 %v1608_v0  ;;  %1282 = vmatprep.mubr.msk.bf16.mxu0 %vm1609_vm0, %v1608_v0  ;;  %v1928_v2 = vld [vmem:[%s497_s8] sm:$0xf]  ;;  %v653_v3 = vsel %vm651_vm1, %v639_v1, 0  ;;  %vm738_vm3 = vcmask 1043456  }
  0x9f   : > { %1286 = vmatprep.subr.bf16.mxu1 %v1608_v0  ;;  %1288 = vmatprep.mubr.msk.bf16.mxu1 %vm1609_vm0, %v1608_v0  ;;  %v638_v4 = vpack.c.bf16 %v1928_v2, %v1928_v2  ;;  %v726_v5 = vld [vmem:[%s2032_s5] sm:$0xf]  ;;  %v1256_v9 = vld [vmem:[#allocation8] ss:$0 sm:$0xff]  ;;  %vm734_vm4 = vcmask 64512   ;;  %s2093_s14 = sld [smem:[#allocation25_spill]] }
  0xa0   : > { %1281 = vmatpush3.bf16.msra.mxu0 %v653_v3  ;;  %v740_v6 = vsel %vm738_vm3, %v726_v5, 0  ;;  %v818_v7 = vld [vmem:[%s2034_s7] sm:$0xf]  ;;  %v782_v47 = vld [vmem:[%s506_s22] sm:$0xf]  ;;  %s2094_s17 = sld [smem:[#allocation17_spill]] }
  0xa1   : > { %1292 = vmatprep.subr.bf16.mxu0 %v1608_v0  ;;  %1287 = vmatpush3.bf16.msra.mxu1 %v740_v6  ;;  %v830_v8 = vsel %vm738_vm3, %v818_v7, 0  ;;  %v1259_v45 = vld [vmem:[%s2033_s6] ss:$0 sm:$0xff]  ;;  %vm918_vm5 = vcmask 130048   ;;  %s2095_s29 = sld [smem:[#allocation26_spill]]  ;;  %s2096_s11 = sld [smem:[#allocation28_spill]] }
  0xa2   : > { %1298 = vmatprep.subr.bf16.mxu1 %v1608_v0  ;;  %v1389_v54 = vld [vmem:[%s2036_s9] sm:$0xff]   ;;  %s2097_s27 = sld [smem:[#allocation29_spill]]  ;;  %s567_s18 = scalar_lea.vmem [#allocation10], %s1900_s23  ;;  %vm636_vm6 = vcmask 27648  }
  0xa3   : > { %1283 = vmatmul.mubr.msk.bf16.vlgmr.msra.gmra.mrb[0].mxu0 %vm647_vm2, %v638_v4  ;;  %s2098_s30 = sld [smem:[#allocation22_spill]]  ;;  %s1028_s19 = sshll.u32 %s567_s18, 4  ;;  %s1980_s19 = int_to_ptr.vmem [resolvable:$true] %s1028_s19 }
  0xa4   : > { %1294 = vmatprep.mubr.msk.bf16.mxu0 %vm1609_vm0, %v1608_v0  ;;  %1293 = vmatpush3.bf16.msra.mxu0 %v830_v8  ;;  %s2099_s8 = sld [smem:[#allocation27_spill]]  ;;  %s1610_s23 = smov [#allocation10]  }
  0xa5   : > { %v1261_v55 = vld [vmem:[%s2093_s14] ss:$0 sm:$0xff] }
  0xa6   : > { %p587_p13 = scmp.lt.s32.totalorder %s2094_s17, 1  ;;  %s1268_s1 = sshll.u32 %s2094_s17, 6 }
  0xa8   : > { %s588_s20 = scalar_select %p587_p13, %s2094_s17, 1 }
  0xa9   : > { %p2100_p0 = scmp.ne.s32.totalorder %s2098_s30, 0  ;;  %s1516_s17 = sshll.u32 %s1610_s23, 4  ;;  %s1517_s17 = int_to_ptr.vmem [resolvable:$false] %s1516_s17 }
  0xaa   : > { %s1253_s22 = sshll.u32 %s588_s20, 3  ;;  %s1518_s16 = scalar_lea.vmem %s1517_s17, 128 }
  0xab   : > { %s593_s28 = scalar_lea.vmem %s2096_s11, %s1253_s22  ;;  %s1512_s22 = scalar_lea.vmem %s1980_s19, 64 }
  0xac   : > { %p1513_p11 = scmp.ne.s32.totalorder %s1980_s19, %s1512_s22  ;;  %p1519_p8 = scmp.lt.s32.totalorder %s1980_s19, %s1517_s17 }
  0xad   : > { %p1520_p6 = scmp.lt.s32.totalorder %s1518_s16, %s1512_s22 }
  0xae   : > { %p1514_p5 = pnand %p1513_p11, %p2100_p0 }
  0xaf   : > { %p1521_p2 = por %p1520_p6, %p1519_p8 }
  0xb0   : > { %p1515_p3 = pneg %p1514_p5 }
  0xb2   : > { %p1522_p4 = pnand %p1521_p2, %p1515_p3 }
 0x176   : > { %v689_v10 = vpop.f32.mrb[0].mxu0 }
 0x177   : > { %v690_v11 = vadd.f32 %v1256_v9, %v689_v10  ;;  %v1284_v12 = vpop.f32.mrb[1].mxu0 }
 0x178   : > { %v692_v13 = vpop.f32.mrb[2].mxu0 }
 0x179   : > { %v696_v14 = vmul.f32 0.70710677, %v690_v11  ;;  %v1285_v15 = vpop.f32.mrb[3].mxu0  ;;  %v695_v41 = vmul.f32 0.5, %v690_v11 }
 0x17b   : > { %v1258_v16 = vclamps-f32 %v696_v14, 4.0 }
 0x17d   : > { %v699_v17 = vmul.f32 %v1258_v16, %v1258_v16 }
 0x17f   : > { %v700_v18 = vmul.f32 -2.7261424e-10, %v699_v17  ;;  %v713_v19 = vmul.f32 -1.45660715e-05, %v699_v17 }
 0x181   : > { %v701_v20 = vadd.f32 2.7706815e-08, %v700_v18  ;;  %v714_v21 = vadd.f32 -0.00021337405, %v713_v19 }
 0x183   : > { %v702_v22 = vmul.f32 %v701_v20, %v699_v17  ;;  %v715_v23 = vmul.f32 %v714_v21, %v699_v17 }
 0x185   : > { %v703_v24 = vadd.f32 -2.101024e-06, %v702_v22  ;;  %v716_v25 = vadd.f32 -0.001682827, %v715_v23 }
 0x187   : > { %v704_v26 = vmul.f32 %v703_v24, %v699_v17  ;;  %v717_v27 = vmul.f32 %v716_v25, %v699_v17 }
 0x189   : > { %v705_v28 = vadd.f32 -5.6925062e-05, %v704_v26  ;;  %v718_v29 = vadd.f32 -0.0073733293, %v717_v27 }
 0x18b   : > { %v706_v30 = vmul.f32 %v705_v28, %v699_v17  ;;  %v719_v31 = vmul.f32 %v718_v29, %v699_v17  ;;  %v1264_v28 = vld [vmem:[%s2095_s29] ss:$0 sm:$0xff]  ;;  %s1978_s29 = scalar_lea.hbm %s2099_s8, %s1268_s1 }
 0x18d   : > { %v707_v32 = vadd.f32 -0.00073499064, %v706_v30  ;;  %v720_v33 = vadd.f32 -0.014264739, %v719_v31  ;;  %v962_v30 = vld [vmem:[%s515_s10] sm:$0xf] }
 0x18e   : > { %s1271_s10 = sshll.u32 %s588_s20, 4  ;;  %s999_s20 = scalar_lea.sflag [#allocation4], %s1897_s15 }
 0x18f   : > { %v708_v34 = vmul.f32 %v707_v32, %v699_v17  ;;  %1390 = vrcp.f32 %v720_v33  ;;  %s601_s24 = scalar_lea.vmem %s2097_s27, %s1271_s10 }
 0x191   : > { %v709_v35 = vadd.f32 -0.0029546, %v708_v34 }
 0x193   : > { %v710_v36 = vmul.f32 %v709_v35, %v699_v17 }
 0x195   : > { %v711_v37 = vadd.f32 -0.016096033, %v710_v36 }
 0x197   : > { %v712_v38 = vmul.f32 %v1258_v16, %v711_v37 }
 0x199   : > { %v1391_v39 = vpop.eup %1390 }
 0x19a   : > { %v722_v40 = vmul.f32 %v1391_v39, %v712_v38 }
 0x19c   : > { %v723_v42 = vadd.f32 1.0, %v722_v40 }
 0x19e   : > { %v724_v43 = vmul.f32 %v723_v42, %v695_v41 }
 0x1a0   : > { %v725_v44 = vpack.c.bf16 %v724_v43, %v724_v43 }
 0x1a2   : > { %1289 = vmatmul.mubr.msk.bf16.vlgmr.msra.gmra.mrb[0].mxu1 %vm734_vm4, %v725_v44 }
 0x1a3   : > { %1300 = vmatprep.mubr.msk.bf16.mxu1 %vm1609_vm0, %v1608_v0  ;;  %1299 = vmatpush3.bf16.msra.mxu1 %v1389_v54 }
 0x275   : > { %v776_v46 = vpop.f32.mrb[0].mxu1 }
 0x276   : > { %v777_v48 = vadd.f32 %v1259_v45, %v776_v46  ;;  %v1290_v49 = vpop.f32.mrb[1].mxu1 }
 0x277   : > { %v779_v50 = vpop.f32.mrb[2].mxu1 }
 0x278   : > { %v1291_v51 = vpop.f32.mrb[3].mxu1  ;;  %v783_v52 = vadd.f32 %v782_v47, %v777_v48 }
 0x27a   : > { %784 = vxpose.xlu1.b32.start.end [1/1] (short) (narrow) %v783_v52, 8  ;;  %v817_v53 = vpack.c.bf16 %v783_v52, %v783_v52 }
 0x27c   : > { %1295 = vmatmul.mubr.msk.bf16.vlgmr.msra.gmra.mrb[4].mxu0 %vm734_vm4, %v817_v53 }
 0x2fa   : > { %v800_v36 = vpop.trf.xlu1 }
 0x2fb   : > { %816 = vst.msk [vmem:[%s593_s28] sm:$0xff] %vm647_vm2, %v800_v36 }
 0x34f   : > { %v866_v56 = vpop.f32.mrb[4].mxu0 }
 0x350   : > { %v867_v57 = vadd.f32 %v1261_v55, %v866_v56  ;;  %v1296_v58 = vpop.f32.mrb[5].mxu0 }
 0x351   : > { %v869_v59 = vpop.f32.mrb[6].mxu0 }
 0x352   : > { %v873_v60 = vmul.f32 0.70710677, %v867_v57  ;;  %v1297_v61 = vpop.f32.mrb[7].mxu0  ;;  %v872_v24 = vmul.f32 0.5, %v867_v57 }
 0x354   : > { %v1263_v62 = vclamps-f32 %v873_v60, 4.0 }
 0x356   : > { %v876_v63 = vmul.f32 %v1263_v62, %v1263_v62 }
 0x358   : > { %v877_v0 = vmul.f32 -2.7261424e-10, %v876_v63  ;;  %v890_v1 = vmul.f32 -1.45660715e-05, %v876_v63 }
 0x35a   : > { %v878_v3 = vadd.f32 2.7706815e-08, %v877_v0  ;;  %v891_v4 = vadd.f32 -0.00021337405, %v890_v1 }
 0x35c   : > { %v879_v5 = vmul.f32 %v878_v3, %v876_v63  ;;  %v892_v6 = vmul.f32 %v891_v4, %v876_v63 }
 0x35e   : > { %v880_v7 = vadd.f32 -2.101024e-06, %v879_v5  ;;  %v893_v8 = vadd.f32 -0.001682827, %v892_v6 }
 0x360   : > { %v881_v9 = vmul.f32 %v880_v7, %v876_v63  ;;  %v894_v10 = vmul.f32 %v893_v8, %v876_v63 }
 0x362   : > { %v882_v11 = vadd.f32 -5.6925062e-05, %v881_v9  ;;  %v895_v12 = vadd.f32 -0.0073733293, %v894_v10 }
 0x364   : > { %v883_v13 = vmul.f32 %v882_v11, %v876_v63  ;;  %v896_v14 = vmul.f32 %v895_v12, %v876_v63 }
 0x366   : > { %v884_v15 = vadd.f32 -0.00073499064, %v883_v13  ;;  %v897_v16 = vadd.f32 -0.014264739, %v896_v14 }
 0x368   : > { %v885_v17 = vmul.f32 %v884_v15, %v876_v63  ;;  %1392 = vrcp.f32 %v897_v16 }
 0x36a   : > { %v886_v18 = vadd.f32 -0.0029546, %v885_v17 }
 0x36c   : > { %v887_v19 = vmul.f32 %v886_v18, %v876_v63 }
 0x36e   : > { %v888_v20 = vadd.f32 -0.016096033, %v887_v19 }
 0x370   : > { %v889_v21 = vmul.f32 %v1263_v62, %v888_v20 }
 0x372   : > { %v1393_v22 = vpop.eup %1392 }
 0x373   : > { %v899_v23 = vmul.f32 %v1393_v22, %v889_v21 }
 0x375   : > { %v900_v25 = vadd.f32 1.0, %v899_v23 }
 0x377   : > { %v901_v26 = vmul.f32 %v900_v25, %v872_v24 }
 0x379   : > { %v902_v27 = vpack.c.bf16 %v901_v26, %v901_v26 }
 0x37b   : > { %1301 = vmatmul.mubr.msk.bf16.vlgmr.msra.gmra.mrb[4].mxu1 %vm918_vm5, %v902_v27 }
 0x44e   : > { %v956_v29 = vpop.f32.mrb[4].mxu1 }
 0x44f   : > { %v957_v31 = vadd.f32 %v1264_v28, %v956_v29  ;;  %v1302_v32 = vpop.f32.mrb[5].mxu1 }
 0x450   : > { %v959_v33 = vpop.f32.mrb[6].mxu1 }
 0x451   : > { %v1303_v34 = vpop.f32.mrb[7].mxu1  ;;  %v963_v35 = vadd.f32 %v962_v30, %v957_v31 }
 0x453   : > { %964 = vxpose.xlu0.b32.start.end [1/1] (short) (narrow) %v963_v35, 16 }
 0x458   : > { %604 = vxpose.xlu0.b32.start.end [1/1] (short) (narrow) %v1928_v2, 8 }
 0x4d3   : > { %v980_v37 = vpop.trf.xlu0 }
 0x4d4   : > { %996 = vst.msk [vmem:[%s601_s24] sm:$0xff] %vm647_vm2, %v980_v37 }
 0x4d7   : > { %v981_v2 = vpop.trf.xlu0 }
 0x4d8   : > { %997 = vst.msk [vmem:[%s601_s24 + $0x8] sm:$0xff] %vm647_vm2, %v981_v2 }
 0x4db   : > { %v620_v38 = vpop.trf.xlu0 }
 0x4dc   : > { %637 = vst.msk [vmem:[%s567_s18] sm:$0xf] %vm636_vm6, %v620_v38 }
 0x4dd   : > { %1525 = shalt.err (!%p1522_p4)
}
 0x4de   : > { %s1526_s15 = scalar_lea.hbm %s1978_s29, 64  ;;  %s1530_s28 = scalar_lea.hbm %s2099_s8, 128 }
 0x4df   : > { %p1527_p12 = scmp.ne.s32.totalorder %s1978_s29, %s1526_s15  ;;  %p1531_p10 = scmp.lt.u32.totalorder %s1978_s29, %s2099_s8 }
 0x4e0   : > { %p1532_p1 = scmp.lt.u32.totalorder %s1530_s28, %s1526_s15  ;;  %p1534_p11 = scmp.lt.u32.totalorder %s1526_s15, %s1978_s29 }
 0x4e1   : > { %p1528_p7 = pnand %p1527_p12, %p2100_p0 }
 0x4e2   : > { %p1533_p13 = por %p1532_p1, %p1531_p10 }
 0x4e3   : > { %p1529_p9 = pneg %p1528_p7 }
 0x4e4   : > { %p1535_p5 = por %p1534_p11, %p1533_p13 }
 0x4e6   : > { %p1536_p3 = pnand %p1535_p5, %p1529_p9 }
 0x4e8   : > { %1539 = shalt.err (!%p1536_p3)
}
 0x4e9   : > { %1314 = dma.vmem_to_hbm [thread:$0]  (%p2100_p0), %s1980_s19, 64, %s1978_s29, %s999_s20  }
 0x4ea PF: > { %s2101_s21 = sld [smem:[#allocation15_spill]]  ;;  %s2102_s27 = sld [smem:[#allocation23_spill]] }
 0x4eb   : > { %s2103_s24 = sld [smem:[#allocation19_spill]] }
 0x4f0   : > { %s1046_s1 = sand.u32 1, %s2101_s21   ;;  %p2104_p8 = scmp.ne.s32.totalorder %s2102_s27, 0 }
 0x4f1   : > { %p2105_p6 = scmp.ge.s32.totalorder %s2103_s24, 2  ;;  %s1047_s18 = scalar_lea.sflag [#allocation4], %s1046_s1 }
 0x4f3   : > { %p1331_p2 = pnand %p2105_p6, %p2104_p8 }
 0x4f5   : > { %1577 = dma.done.wait (!%p1331_p2), %s1047_s18, 64  }
 0x4f6   : > { %1579 = vsyncadd (!%p1331_p2), %s1047_s18, 4294967232  ;;  %s34_s30 = sadd.s32 1, %s2103_s24   ;;  %s2106_s14 = sld [smem:[#allocation16_spill]] }
 0x4f7   : > { %p31_p4 = scmp.ge.s32.totalorder %s34_s30, 4   ;;  %s2107_s27 = sld [smem:[#allocation21_spill]] }
 0x4f8   : > { %s2108_s28 = sld [smem:[#allocation18_spill]]  ;;  %s2109_s29 = sld [smem:[#allocation20_spill]] }
 0x4f9   : > { %s2110_s25 = smov %s1586_s26  ;;  %33 = sbr.rel (!%p31_p4) target bundleno = 16 (0x10), region = 161 }
 0x4fc   : > { %s2111_s26 = smov %s2106_s14 }
 0x500   :  { %1073 = vsyncpa [#allocation3], 1 }
 0x501   :  { %1075 = vsyncpa [#allocation3 + $0x1], 1 }
 0x502   :  { %1076 = vsyncpa [#allocation6], 1 }
 0x503   :  { %1078 = vsyncpa [#allocation6 + $0x1], 1 }
 0x504   :  { %1079 = vsyncpa [#allocation9], 1 }
 0x505   :  { %1080 = vsyncpa [#allocation4], 1 }
 0x506   :  { %1082 = vsyncpa [#allocation4 + $0x1], 1 }

</bundles_post_ra>
